<compile_context>
chip_gen: v5e
topology: v5e:2x2
jax: 0.10.0
libtpu: 0.0.40
codegen_flags: <defaults>
</compile_context>

<pallas_src>
import functools

import jax
import jax.numpy as jnp
import numpy as np
from jax.experimental import pallas as pl
from jax.experimental.pallas import tpu as pltpu


def _cnl_kernel(xh_ref, xl_ref,
                wgp_ref, wt_ref, wwf_ref,
                blow_ref, bwf_ref,
                out_ref, *, low_dim):
    """One block of `bb` batch elements per grid step.

    xh_ref : (bb, high, N)  bf16
    xl_ref : (bb, low,  N)  bf16
    wgp_ref: (2*low, low)   bf16   stacked [wg; wp]
    wt_ref : (low, high)    bf16
    wwf_ref: (high, low)    f32    BN scale and 1/low folded in
    blow_ref:(3*low, 1)     f32    packed [bg; bp; bt]
    bwf_ref: (high, 1)      f32    BN-folded W bias
    out_ref: (bb, high, N)
    """
    wgp = wgp_ref[...]
    wt = wt_ref[...]
    wwf = wwf_ref[...]
    b_low = blow_ref[...]
    bwf = bwf_ref[...]

    bgp = b_low[: 2 * low_dim, :]     # (2*low, 1)
    bt = b_low[2 * low_dim:, :]       # (low, 1)

    bb = xh_ref.shape[0]
    for b in range(bb):               # small, statically unrolled
        xh = xh_ref[b]                # (high, N) bf16
        xl = xl_ref[b]                # (low,  N) bf16

        # Stacked g/phi 1x1 conv: one MXU matmul instead of two.
        gp = jnp.dot(wgp, xl, preferred_element_type=jnp.float32) + bgp      # (2*low, N)
        g_x = gp[:low_dim, :]                                                # (low, N)
        phi_x = gp[low_dim:, :]                                              # (low, N)

        theta_x = jnp.dot(wt, xh, preferred_element_type=jnp.float32) + bt   # (low, N)

        # energy = theta @ phi^T  (contraction over spatial N); bf16 in, f32 acc.
        energy = jax.lax.dot_general(
            theta_x.astype(jnp.bfloat16), phi_x.astype(jnp.bfloat16),
            dimension_numbers=(((1,), (1,)), ((), ())),
            preferred_element_type=jnp.float32)                              # (low, low)

        # Reassociated output path:
        #   W_BN(attention @ g_x) + bias == (wwf @ energy) @ g_x + bwf
        # (1/low and BN scale already folded into wwf; tiny matmul kept in f32.)
        m = jnp.dot(wwf, energy, preferred_element_type=jnp.float32)         # (high, low)
        w_y = jnp.dot(m.astype(jnp.bfloat16), g_x.astype(jnp.bfloat16),
                      preferred_element_type=jnp.float32) + bwf              # (high, N)

        out_ref[b] = (w_y + xh.astype(jnp.float32)).astype(out_ref.dtype)


def cnl_forward(x_h, x_l, params, *, flag=0, eps=1e-5, batch_block=None):
    """Pallas implementation of CNL.forward (flag=0, BatchNorm eval). Inputs NCHW."""
    if flag != 0:
        # TODO(synk): flag=1 (stride-2 phi / W) not implemented.
        raise NotImplementedError("CNL Pallas kernel only implements flag=0")

    B, Ch, Hh, Wh = x_h.shape
    Bl, Cl, Hl, Wl = x_l.shape
    assert B == Bl
    N = Hh * Wh
    assert Hl * Wl == N, "flag=0 requires matching flattened spatial sizes"

    out_dtype = x_h.dtype

    # Flatten NCHW -> (B, C, N); cast matmul operands to bf16 (f32 accumulate in-kernel).
    xh_f = x_h.reshape(B, Ch, N).astype(jnp.bfloat16)
    xl_f = x_l.reshape(B, Cl, N).astype(jnp.bfloat16)

    # ---- wrapper-side weight folding (glue, zero accuracy cost) -----------------
    # Stack g and phi 1x1-conv weights into one (2*low, low) matmul on x_l.
    wgp = jnp.concatenate([params["wg"], params["wp"]], axis=0).astype(jnp.bfloat16)
    wt = params["wt"].astype(jnp.bfloat16)

    # Fold BatchNorm (eval) and the 1/energy.shape[-1] (= 1/low) normalizer into W.
    scale = params["bn_gamma"] / jnp.sqrt(params["bn_var"] + eps)        # (high,)
    shift = params["bn_beta"] - scale * params["bn_mean"]                # (high,)
    wwf = ((scale[:, None] * params["ww"]) * (1.0 / Cl)).astype(jnp.float32)  # (high, low)
    bwf = (scale * params["bw"] + shift).reshape(Ch, 1).astype(jnp.float32)   # (high, 1)

    # Pack the three low-dim biases into a single input block: [bg; bp; bt].
    b_low = jnp.concatenate(
        [params["bg"], params["bp"], params["bt"]], axis=0
    ).reshape(3 * Cl, 1).astype(jnp.float32)

    # ---- choose batch block size (amortize per-step overhead, bound VMEM) -------
    itemsize_out = jnp.dtype(out_dtype).itemsize
    per_batch_bytes = (Ch + Cl) * N * 2 + Ch * N * itemsize_out
    if batch_block is None:
        bb = 1
        for cand in range(1, min(B, 8) + 1):
            if B % cand == 0 and cand * per_batch_bytes * 2 <= (8 << 20):
                bb = cand
    else:
        bb = batch_block
    assert B % bb == 0

    block_bytes = 2 * bb * per_batch_bytes                 # rough double-buffered estimate
    vmem_limit = int(min(32 << 20, max(8 << 20, 3 * block_bytes)))

    rep = lambda arr: pl.BlockSpec(arr.shape, lambda i: (0, 0))
    kernel = functools.partial(_cnl_kernel, low_dim=Cl)

    out = pl.pallas_call(
        kernel,
        out_shape=jax.ShapeDtypeStruct((B, Ch, N), out_dtype),
        grid=(B // bb,),
        in_specs=[
            pl.BlockSpec((bb, Ch, N), lambda i: (i, 0, 0)),   # x_h
            pl.BlockSpec((bb, Cl, N), lambda i: (i, 0, 0)),   # x_l
            rep(wgp), rep(wt), rep(wwf), rep(b_low), rep(bwf),
        ],
        out_specs=pl.BlockSpec((bb, Ch, N), lambda i: (i, 0, 0)),
        compiler_params=pltpu.CompilerParams(
            dimension_semantics=("parallel",),
            vmem_limit_bytes=vmem_limit),
    )(xh_f, xl_f, wgp, wt, wwf, b_low, bwf)

    return out.reshape(B, Ch, Hh, Wh)


def cnl_reference(x_h, x_l, params, *, eps=1e-5):
    """Pure-JAX f32 reference matching the PyTorch forward (flag=0, BN eval)."""
    B, Ch, H, W = x_h.shape
    Cl = x_l.shape[1]
    N = H * W
    xh = x_h.reshape(B, Ch, N)
    xl = x_l.reshape(B, Cl, N)
    g_x = jnp.einsum("oc,bcn->bon", params["wg"], xl) + params["bg"][None, :, None]
    theta = jnp.einsum("oc,bcn->bon", params["wt"], xh) + params["bt"][None, :, None]
    phi = jnp.einsum("oc,bcn->bon", params["wp"], xl) + params["bp"][None, :, None]
    energy = jnp.einsum("bcn,bdn->bcd", theta, phi)
    attention = energy / energy.shape[-1]
    y = jnp.einsum("bcd,bdn->bcn", attention, g_x)
    w_y = jnp.einsum("oc,bcn->bon", params["ww"], y) + params["bw"][None, :, None]
    scale = params["bn_gamma"] / jnp.sqrt(params["bn_var"] + eps)
    shift = params["bn_beta"] - scale * params["bn_mean"]
    z = scale[None, :, None] * w_y + shift[None, :, None] + xh
    return z.reshape(B, Ch, H, W)


def init_params(key, high_dim, low_dim):
    ks = jax.random.split(key, 12)
    p = {
        # 1x1 conv weights (out, in) — squeezed from PyTorch (out, in, 1, 1)
        "wg": jax.random.normal(ks[0], (low_dim, low_dim), jnp.float32) * 0.05,
        "bg": jax.random.normal(ks[1], (low_dim,), jnp.float32) * 0.01,
        "wt": jax.random.normal(ks[2], (low_dim, high_dim), jnp.float32) * 0.05,
        "bt": jax.random.normal(ks[3], (low_dim,), jnp.float32) * 0.01,
        "wp": jax.random.normal(ks[4], (low_dim, low_dim), jnp.float32) * 0.05,
        "bp": jax.random.normal(ks[5], (low_dim,), jnp.float32) * 0.01,
        "ww": jax.random.normal(ks[6], (high_dim, low_dim), jnp.float32) * 0.05,
        "bw": jax.random.normal(ks[7], (high_dim,), jnp.float32) * 0.01,
        # BatchNorm2d(high_dim). NOTE: the PyTorch module inits gamma=beta=0 (which
        # degenerates the W path); we test with NONZERO eval stats/affine so the
        # attention / W / BN path is numerically exercised (per review).
        "bn_gamma": 1.0 + 0.1 * jax.random.normal(ks[8], (high_dim,), jnp.float32),
        "bn_beta": 0.1 * jax.random.normal(ks[9], (high_dim,), jnp.float32),
        "bn_mean": 0.1 * jax.random.normal(ks[10], (high_dim,), jnp.float32),
        "bn_var": 0.5 + jax.random.uniform(ks[11], (high_dim,), jnp.float32),
    }
    return p


if __name__ == "__main__":
    B = 2
    high_dim = 32
    low_dim = 16
    H = W = 16  # flag=0: x_h and x_l share spatial size; N = 256 (lane-dense)

    key = jax.random.PRNGKey(0)
    k_xh, k_xl, k_p = jax.random.split(key, 3)
    x_h = jax.random.normal(k_xh, (B, high_dim, H, W), jnp.float32)
    x_l = jax.random.normal(k_xl, (B, low_dim, H, W), jnp.float32)
    params = init_params(k_p, high_dim, low_dim)

    out = cnl_forward(x_h, x_l, params)
    out = jax.block_until_ready(out)

    ref = cnl_reference(x_h, x_l, params)
    # bf16 matmul operands (incl. the residual's bf16-rounded x_h) -> looser tolerance.
    np.testing.assert_allclose(np.asarray(out), np.asarray(ref), rtol=2e-2, atol=2e-2)

    print("KERNEL_OK")
</pallas_src>

<mosaic_0001>
module attributes {stable_mosaic.version = 11 : i64} {
  func.func @_cnl_kernel(%arg0: i32, %arg1: memref<2x32x256xbf16, #tpu.memory_space<vmem>>, %arg2: memref<2x16x256xbf16, #tpu.memory_space<vmem>>, %arg3: memref<32x16xbf16, #tpu.memory_space<vmem>>, %arg4: memref<16x32xbf16, #tpu.memory_space<vmem>>, %arg5: memref<32x16xf32, #tpu.memory_space<vmem>>, %arg6: memref<48x1xf32, #tpu.memory_space<vmem>>, %arg7: memref<32x1xf32, #tpu.memory_space<vmem>>, %arg8: memref<2x32x256xf32, #tpu.memory_space<vmem>>) attributes {dimension_semantics = [#tpu.dimension_semantics<parallel>], iteration_bounds = array<i64: 1>, scalar_prefetch = 0 : i64, scratch_operands = 0 : i64, tpu.core_type = #tpu.core_type<tc>, window_params = [{transform_indices = @transform_0, window_bounds = array<i64: 2, 32, 256>}, {transform_indices = @transform_1, window_bounds = array<i64: 2, 16, 256>}, {pipeline_mode = #tpu.pipeline_mode<synchronous>, transform_indices = @transform_2, window_bounds = array<i64: 32, 16>}, {pipeline_mode = #tpu.pipeline_mode<synchronous>, transform_indices = @transform_3, window_bounds = array<i64: 16, 32>}, {pipeline_mode = #tpu.pipeline_mode<synchronous>, transform_indices = @transform_4, window_bounds = array<i64: 32, 16>}, {pipeline_mode = #tpu.pipeline_mode<synchronous>, transform_indices = @transform_5, window_bounds = array<i64: 48, 1>}, {pipeline_mode = #tpu.pipeline_mode<synchronous>, transform_indices = @transform_6, window_bounds = array<i64: 32, 1>}, {transform_indices = @transform_7, window_bounds = array<i64: 2, 32, 256>}]} {
    %c0 = arith.constant 0 : index
    %c0_0 = arith.constant 0 : index
    %0 = vector.load %arg3[%c0, %c0_0] : memref<32x16xbf16, #tpu.memory_space<vmem>>, vector<32x16xbf16>
    %c0_1 = arith.constant 0 : index
    %c0_2 = arith.constant 0 : index
    %1 = vector.load %arg4[%c0_1, %c0_2] : memref<16x32xbf16, #tpu.memory_space<vmem>>, vector<16x32xbf16>
    %c0_3 = arith.constant 0 : index
    %c0_4 = arith.constant 0 : index
    %2 = vector.load %arg5[%c0_3, %c0_4] : memref<32x16xf32, #tpu.memory_space<vmem>>, vector<32x16xf32>
    %c0_5 = arith.constant 0 : index
    %c0_6 = arith.constant 0 : index
    %3 = vector.load %arg6[%c0_5, %c0_6] : memref<48x1xf32, #tpu.memory_space<vmem>>, vector<48x1xf32>
    %c0_7 = arith.constant 0 : index
    %c0_8 = arith.constant 0 : index
    %4 = vector.load %arg7[%c0_7, %c0_8] : memref<32x1xf32, #tpu.memory_space<vmem>>, vector<32x1xf32>
    %5 = vector.extract_strided_slice %3 {offsets = [0, 0], sizes = [32, 1], strides = [1, 1]} : vector<48x1xf32> to vector<32x1xf32>
    %6 = vector.extract_strided_slice %3 {offsets = [32, 0], sizes = [16, 1], strides = [1, 1]} : vector<48x1xf32> to vector<16x1xf32>
    %c0_9 = arith.constant 0 : index
    %c0_10 = arith.constant 0 : index
    %c0_11 = arith.constant 0 : index
    %7 = vector.load %arg1[%c0_9, %c0_10, %c0_11] : memref<2x32x256xbf16, #tpu.memory_space<vmem>>, vector<1x32x256xbf16>
    %8 = vector.shape_cast %7 : vector<1x32x256xbf16> to vector<32x256xbf16>
    %c0_12 = arith.constant 0 : index
    %c0_13 = arith.constant 0 : index
    %c0_14 = arith.constant 0 : index
    %9 = vector.load %arg2[%c0_12, %c0_13, %c0_14] : memref<2x16x256xbf16, #tpu.memory_space<vmem>>, vector<1x16x256xbf16>
    %10 = vector.shape_cast %9 : vector<1x16x256xbf16> to vector<16x256xbf16>
    %cst = arith.constant dense<0.000000e+00> : vector<32x256xf32>
    %11 = tpu.matmul %0, %10, %cst {dimension_numbers = #tpu.dot_dimension_numbers<[1], [0], [0], [1], [0, 0, 1, 1], [], []>} : vector<32x16xbf16>, vector<16x256xbf16>, vector<32x256xf32> -> vector<32x256xf32>
    %12 = vector.broadcast %5 : vector<32x1xf32> to vector<32x256xf32>
    %13 = arith.addf %11, %12 : vector<32x256xf32>
    %14 = vector.extract_strided_slice %13 {offsets = [0, 0], sizes = [16, 256], strides = [1, 1]} : vector<32x256xf32> to vector<16x256xf32>
    %15 = vector.extract_strided_slice %13 {offsets = [16, 0], sizes = [16, 256], strides = [1, 1]} : vector<32x256xf32> to vector<16x256xf32>
    %cst_15 = arith.constant dense<0.000000e+00> : vector<16x256xf32>
    %16 = tpu.matmul %1, %8, %cst_15 {dimension_numbers = #tpu.dot_dimension_numbers<[1], [0], [0], [1], [0, 0, 1, 1], [], []>} : vector<16x32xbf16>, vector<32x256xbf16>, vector<16x256xf32> -> vector<16x256xf32>
    %17 = vector.broadcast %6 : vector<16x1xf32> to vector<16x256xf32>
    %18 = arith.addf %16, %17 : vector<16x256xf32>
    %19 = arith.truncf %18 : vector<16x256xf32> to vector<16x256xbf16>
    %20 = arith.truncf %15 : vector<16x256xf32> to vector<16x256xbf16>
    %cst_16 = arith.constant dense<0.000000e+00> : vector<16x16xf32>
    %21 = tpu.matmul %19, %20, %cst_16 {dimension_numbers = #tpu.dot_dimension_numbers<[1], [1], [0], [0], [0, 0, 1, 0], [], []>} : vector<16x256xbf16>, vector<16x256xbf16>, vector<16x16xf32> -> vector<16x16xf32>
    %cst_17 = arith.constant dense<0.000000e+00> : vector<32x16xf32>
    %22 = tpu.matmul %2, %21, %cst_17 {dimension_numbers = #tpu.dot_dimension_numbers<[1], [0], [0], [1], [0, 0, 1, 1], [], []>} : vector<32x16xf32>, vector<16x16xf32>, vector<32x16xf32> -> vector<32x16xf32>
    %23 = arith.truncf %22 : vector<32x16xf32> to vector<32x16xbf16>
    %24 = arith.truncf %14 : vector<16x256xf32> to vector<16x256xbf16>
    %cst_18 = arith.constant dense<0.000000e+00> : vector<32x256xf32>
    %25 = tpu.matmul %23, %24, %cst_18 {dimension_numbers = #tpu.dot_dimension_numbers<[1], [0], [0], [1], [0, 0, 1, 1], [], []>} : vector<32x16xbf16>, vector<16x256xbf16>, vector<32x256xf32> -> vector<32x256xf32>
    %26 = vector.broadcast %4 : vector<32x1xf32> to vector<32x256xf32>
    %27 = arith.addf %25, %26 : vector<32x256xf32>
    %28 = arith.extf %8 : vector<32x256xbf16> to vector<32x256xf32>
    %29 = arith.addf %27, %28 : vector<32x256xf32>
    %c0_19 = arith.constant 0 : index
    %c0_20 = arith.constant 0 : index
    %c0_21 = arith.constant 0 : index
    %30 = vector.load %arg8[%c0_19, %c0_20, %c0_21] : memref<2x32x256xf32, #tpu.memory_space<vmem>>, vector<1x32x256xf32>
    %31 = vector.shape_cast %30 : vector<1x32x256xf32> to vector<32x256xf32>
    %32 = vector.shape_cast %29 : vector<32x256xf32> to vector<1x32x256xf32>
    tpu.vector_store %arg8[%c0_19, %c0_20, %c0_21], %32 {strides = array<i32>} : memref<2x32x256xf32, #tpu.memory_space<vmem>>, vector<1x32x256xf32>,
    %c1 = arith.constant 1 : index
    %c0_22 = arith.constant 0 : index
    %c0_23 = arith.constant 0 : index
    %33 = vector.load %arg1[%c1, %c0_22, %c0_23] : memref<2x32x256xbf16, #tpu.memory_space<vmem>>, vector<1x32x256xbf16>
    %34 = vector.shape_cast %33 : vector<1x32x256xbf16> to vector<32x256xbf16>
    %c1_24 = arith.constant 1 : index
    %c0_25 = arith.constant 0 : index
    %c0_26 = arith.constant 0 : index
    %35 = vector.load %arg2[%c1_24, %c0_25, %c0_26] : memref<2x16x256xbf16, #tpu.memory_space<vmem>>, vector<1x16x256xbf16>
    %36 = vector.shape_cast %35 : vector<1x16x256xbf16> to vector<16x256xbf16>
    %cst_27 = arith.constant dense<0.000000e+00> : vector<32x256xf32>
    %37 = tpu.matmul %0, %36, %cst_27 {dimension_numbers = #tpu.dot_dimension_numbers<[1], [0], [0], [1], [0, 0, 1, 1], [], []>} : vector<32x16xbf16>, vector<16x256xbf16>, vector<32x256xf32> -> vector<32x256xf32>
    %38 = vector.broadcast %5 : vector<32x1xf32> to vector<32x256xf32>
    %39 = arith.addf %37, %38 : vector<32x256xf32>
    %40 = vector.extract_strided_slice %39 {offsets = [0, 0], sizes = [16, 256], strides = [1, 1]} : vector<32x256xf32> to vector<16x256xf32>
    %41 = vector.extract_strided_slice %39 {offsets = [16, 0], sizes = [16, 256], strides = [1, 1]} : vector<32x256xf32> to vector<16x256xf32>
    %cst_28 = arith.constant dense<0.000000e+00> : vector<16x256xf32>
    %42 = tpu.matmul %1, %34, %cst_28 {dimension_numbers = #tpu.dot_dimension_numbers<[1], [0], [0], [1], [0, 0, 1, 1], [], []>} : vector<16x32xbf16>, vector<32x256xbf16>, vector<16x256xf32> -> vector<16x256xf32>
    %43 = vector.broadcast %6 : vector<16x1xf32> to vector<16x256xf32>
    %44 = arith.addf %42, %43 : vector<16x256xf32>
    %45 = arith.truncf %44 : vector<16x256xf32> to vector<16x256xbf16>
    %46 = arith.truncf %41 : vector<16x256xf32> to vector<16x256xbf16>
    %cst_29 = arith.constant dense<0.000000e+00> : vector<16x16xf32>
    %47 = tpu.matmul %45, %46, %cst_29 {dimension_numbers = #tpu.dot_dimension_numbers<[1], [1], [0], [0], [0, 0, 1, 0], [], []>} : vector<16x256xbf16>, vector<16x256xbf16>, vector<16x16xf32> -> vector<16x16xf32>
    %cst_30 = arith.constant dense<0.000000e+00> : vector<32x16xf32>
    %48 = tpu.matmul %2, %47, %cst_30 {dimension_numbers = #tpu.dot_dimension_numbers<[1], [0], [0], [1], [0, 0, 1, 1], [], []>} : vector<32x16xf32>, vector<16x16xf32>, vector<32x16xf32> -> vector<32x16xf32>
    %49 = arith.truncf %48 : vector<32x16xf32> to vector<32x16xbf16>
    %50 = arith.truncf %40 : vector<16x256xf32> to vector<16x256xbf16>
    %cst_31 = arith.constant dense<0.000000e+00> : vector<32x256xf32>
    %51 = tpu.matmul %49, %50, %cst_31 {dimension_numbers = #tpu.dot_dimension_numbers<[1], [0], [0], [1], [0, 0, 1, 1], [], []>} : vector<32x16xbf16>, vector<16x256xbf16>, vector<32x256xf32> -> vector<32x256xf32>
    %52 = vector.broadcast %4 : vector<32x1xf32> to vector<32x256xf32>
    %53 = arith.addf %51, %52 : vector<32x256xf32>
    %54 = arith.extf %34 : vector<32x256xbf16> to vector<32x256xf32>
    %55 = arith.addf %53, %54 : vector<32x256xf32>
    %c1_32 = arith.constant 1 : index
    %c0_33 = arith.constant 0 : index
    %c0_34 = arith.constant 0 : index
    %56 = vector.load %arg8[%c1_32, %c0_33, %c0_34] : memref<2x32x256xf32, #tpu.memory_space<vmem>>, vector<1x32x256xf32>
    %57 = vector.shape_cast %56 : vector<1x32x256xf32> to vector<32x256xf32>
    %58 = vector.shape_cast %55 : vector<32x256xf32> to vector<1x32x256xf32>
    tpu.vector_store %arg8[%c1_32, %c0_33, %c0_34], %58 {strides = array<i32>} : memref<2x32x256xf32, #tpu.memory_space<vmem>>, vector<1x32x256xf32>,
    return
  }
  func.func @transform_0(%arg0: i32) -> (i32, i32, i32) {
    %c0_i32 = arith.constant 0 : i32
    %c0_i32_0 = arith.constant 0 : i32
    %c0_i32_1 = arith.constant 0 : i32
    return %arg0, %c0_i32, %c0_i32_0 : i32, i32, i32
  }
  func.func @transform_1(%arg0: i32) -> (i32, i32, i32) {
    %c0_i32 = arith.constant 0 : i32
    %c0_i32_0 = arith.constant 0 : i32
    %c0_i32_1 = arith.constant 0 : i32
    return %arg0, %c0_i32, %c0_i32_0 : i32, i32, i32
  }
  func.func @transform_2(%arg0: i32) -> (i32, i32) {
    %c0_i32 = arith.constant 0 : i32
    %c0_i32_0 = arith.constant 0 : i32
    %c0_i32_1 = arith.constant 0 : i32
    return %c0_i32, %c0_i32_0 : i32, i32
  }
  func.func @transform_3(%arg0: i32) -> (i32, i32) {
    %c0_i32 = arith.constant 0 : i32
    %c0_i32_0 = arith.constant 0 : i32
    %c0_i32_1 = arith.constant 0 : i32
    return %c0_i32, %c0_i32_0 : i32, i32
  }
  func.func @transform_4(%arg0: i32) -> (i32, i32) {
    %c0_i32 = arith.constant 0 : i32
    %c0_i32_0 = arith.constant 0 : i32
    %c0_i32_1 = arith.constant 0 : i32
    return %c0_i32, %c0_i32_0 : i32, i32
  }
  func.func @transform_5(%arg0: i32) -> (i32, i32) {
    %c0_i32 = arith.constant 0 : i32
    %c0_i32_0 = arith.constant 0 : i32
    %c0_i32_1 = arith.constant 0 : i32
    return %c0_i32, %c0_i32_0 : i32, i32
  }
  func.func @transform_6(%arg0: i32) -> (i32, i32) {
    %c0_i32 = arith.constant 0 : i32
    %c0_i32_0 = arith.constant 0 : i32
    %c0_i32_1 = arith.constant 0 : i32
    return %c0_i32, %c0_i32_0 : i32, i32
  }
  func.func @transform_7(%arg0: i32) -> (i32, i32, i32) {
    %c0_i32 = arith.constant 0 : i32
    %c0_i32_0 = arith.constant 0 : i32
    %c0_i32_1 = arith.constant 0 : i32
    return %arg0, %c0_i32, %c0_i32_0 : i32, i32, i32
  }
}

</mosaic_0001>

<bundles_post_ra>
// kernel: tpu_custom_call.1
= control target key start
LH: loop header
LB: loop body
LE: loop exit
PB: predicated region body
PF: predicated region fallthrough
CT: control target
= control target key end

     0   :  { %v770_v7 = vmov 0   ;;  %vm94_vm0 = vcmask 130048   ;;  %s1086_s0 = inlined_call_operand.vmem [shape: bf16[2,32,256], index: 0, kind: input, shape index: {}]   ;;  %s1087_s1 = inlined_call_operand.vmem [shape: bf16[2,16,256], index: 1, kind: input, shape index: {}]   ;;  %s1088_s2 = inlined_call_operand.vmem [shape: bf16[32,16], index: 2, kind: input, shape index: {}]   ;;  %s1089_s3 = inlined_call_operand.vmem [shape: bf16[16,32], index: 3, kind: input, shape index: {}]   ;;  %s1090_s4 = inlined_call_operand.vmem [shape: f32[32,16], index: 4, kind: input, shape index: {}]   ;;  %s1091_s5 = inlined_call_operand.vmem [shape: f32[48,1], index: 5, kind: input, shape index: {}]   ;;  %s1092_s6 = inlined_call_operand.vmem [shape: f32[32,1], index: 6, kind: input, shape index: {}]   ;;  %s1093_s7 = inlined_call_operand.hbm [shape: f32[2,32,256], index: 7, kind: output, shape index: {}]  }
   0x1   :  { %v637_v0 = vld [vmem:[%s1087_s1] sm:$0xf]  ;;  %v729_v1 = vld [vmem:[%s1087_s1 + $0x4] sm:$0xf0]  ;;  %v661_v4 = vld [vmem:[%s1086_s0 + $0x10] sm:$0xf]  ;;  %741 = vset.pattern.permute.xlu0 %v770_v7  ;;  %742 = vset.pattern.permute.xlu1 %v770_v7 }
   0x2   :  { %v823_v2 = vld [vmem:[%s1088_s2 + $0x8] sm:$0xff]  ;;  %v638_v3 = vor.u32 %v729_v1, %v637_v0  ;;  %v727_v5 = vld [vmem:[%s1086_s0 + $0x14] sm:$0xf0]  ;;  %v40_v6 = vld [vmem:[%s1091_s5 + $0x10] sm:$0xff]  ;;  %743 = vset.pattern.permute.xlu2 %v770_v7 }
   0x3   :  { %v662_v8 = vor.u32 %v727_v5, %v661_v4  ;;  %v728_v9 = vld [vmem:[%s1087_s1 + $0x4] sm:$0xf]  ;;  %v639_v10 = vld [vmem:[%s1087_s1 + $0x8] sm:$0xf0]  ;;  %v653_v11 = vld [vmem:[%s1086_s0] sm:$0xf]  ;;  %66 = vperm.xlu0 %741, %v40_v6  }
   0x4   :  { %736 = vmatpush.bf16.msra.mxu1 %v638_v3  ;;  %v642_v12 = vor.u32 %v728_v9, %v639_v10  ;;  %v725_v13 = vld [vmem:[%s1086_s0 + $0x4] sm:$0xf0]  ;;  %v726_v15 = vld [vmem:[%s1086_s0 + $0x14] sm:$0xf]  ;;  %v663_v16 = vld [vmem:[%s1086_s0 + $0x18] sm:$0xf0]  ;;  %108 = vmatpush.bf16.msra.mxu0 %v638_v3 }
   0x5   :  { %184 = vmatpush.bf16.msra.mxu2 %v662_v8  ;;  %v654_v14 = vor.u32 %v725_v13, %v653_v11  ;;  %v666_v17 = vor.u32 %v726_v15, %v663_v16  ;;  %v724_v18 = vld [vmem:[%s1086_s0 + $0x4] sm:$0xf]  ;;  %v655_v19 = vld [vmem:[%s1086_s0 + $0x8] sm:$0xf0] }
   0x8   :  { %127 = vmatpush.bf16.msrb.mxu1 %v642_v12 }
   0x9   :  { %12 = vsyncpa [#allocation3], 0  ;;  %644 = vmatmul.msk.bf16.vlgmr.msra.gmra.mxu1 %vm94_vm0, %v823_v2  ;;  %v42_v20 = vld [vmem:[%s1091_s5 + $0x20] sm:$0xff]  ;;  %198 = vmatpush.bf16.msra.mxu3 %v666_v17  ;;  %vm174_vm1 = vcmask 261120   ;;  %v41_v24 = vld [vmem:[%s1091_s5 + $0x18] sm:$0xff]  ;;  %v658_v25 = vor.u32 %v724_v18, %v655_v19  ;;  %s771_s16 = smov [#allocation2]  }
   0xa   :  { %v866_v21 = vld [vmem:[%s1088_s2] sm:$0xff]  ;;  %141 = vperm.xlu1 %742, %v42_v20   ;;  %185 = vmatpush.bf16.msra.mxu2 %v654_v14  ;;  %v43_v26 = vld [vmem:[%s1091_s5 + $0x28] sm:$0xff]  ;;  %v47_v30 = vld [vmem:[%s1092_s6 + $0x18] sm:$0xff]  ;;  %s613_s17 = sshll.u32 %s771_s16, 4  ;;  %s772_s20 = smov 256   ;;  %s614_s17 = int_to_ptr.vmem [resolvable:$true] %s613_s17 }
   0xb   :  { %v871_v22 = vld [vmem:[%s1089_s3] sm:$0xff]  ;;  %643 = vmatmul.msk.bf16.vlgmr.msra.gmra.mxu0 %vm94_vm0, %v866_v21  ;;  %71 = vperm.xlu0 %741, %v41_v24   ;;  %v39_v27 = vld [vmem:[%s1091_s5 + $0x8] sm:$0xff]  ;;  %v685_v54 = vld [vmem:[%s1087_s1 + $0x10] sm:$0xf]  ;;  %s773_s21 = smov 16  }
   0xc   :  { %v38_v23 = vld [vmem:[%s1091_s5] sm:$0xff]  ;;  %v45_v29 = vld [vmem:[%s1092_s6 + $0x8] sm:$0xff]  ;;  %v735_v55 = vld [vmem:[%s1087_s1 + $0x14] sm:$0xf0] }
   0xd   :  { %56 = vperm.xlu2 %743, %v38_v23   ;;  %667 = vmatmul.msk.bf16.vlgmr.msra.gmra.mxu2 %vm174_vm1, %v871_v22  ;;  %v44_v28 = vld [vmem:[%s1092_s6] sm:$0xff]  ;;  %v686_v59 = vor.u32 %v735_v55, %v685_v54  ;;  %v46_v1 = vld [vmem:[%s1092_s6 + $0x10] sm:$0xff]  ;;  %v687_v8 = vld [vmem:[%s1087_s1 + $0x18] sm:$0xf0] }
   0xe   :  { %199 = vmatpush.bf16.msra.mxu3 %v658_v25  ;;  %v734_v7 = vld [vmem:[%s1087_s1 + $0x14] sm:$0xf]  ;;  %v948_v11 = vld [vmem:[%s1090_s4] sm:$0xff]  ;;  %v955_v14 = vld [vmem:[%s1090_s4 + $0x8] sm:$0xff] }
   0xf   :  { %v690_v12 = vor.u32 %v734_v7, %v687_v8  ;;  %v962_v16 = vld [vmem:[%s1090_s4 + $0x10] sm:$0xff]  ;;  %v969_v18 = vld [vmem:[%s1090_s4 + $0x18] sm:$0xff] }
  0x11   :  { %668 = vmatmul.msk.bf16.vlgmr.msra.gmra.mxu3 %vm174_vm1, %v871_v22 }
  0x12   :  { %146 = vperm.xlu1 %742, %v43_v26  }
  0x13   :  { %285 = vperm.xlu0 %741, %v44_v28  }
  0x15   :  { %61 = vperm.xlu2 %743, %v39_v27  }
  0x19   :  { %645 = vmatmul.msk.bf16.vlgmr.msrb.gmra.mxu1 %vm94_vm0, %v866_v21 }
  0x1a   :  { %290 = vperm.xlu1 %742, %v45_v29  }
  0x1b   :  { %300 = vperm.xlu0 %741, %v47_v30  }
  0x1d   :  { %295 = vperm.xlu2 %743, %v46_v1  }
  0x29   :  { %646 = vmatmul.msk.bf16.gmra.mxu1 %vm94_vm0, %v823_v2 }
  0x67   :  { %v912_v40 = vpop.permute.xlu2 %56 }
  0x6f   :  { %v918_v46 = vpop.permute.xlu2 %61 }
  0x75   :  { %v904_v31 = vpop.permute.xlu0 %66 }
  0x7c   :  { %v908_v34 = vpop.permute.xlu1 %141 }
  0x7d   :  { %v906_v33 = vpop.permute.xlu0 %71 }
  0x84   :  { %v914_v42 = vpop.permute.xlu1 %146 }
  0x85   :  { %v1022_v1 = vpop.permute.xlu0 %285 }
  0x86   :  { %v115_v32 = vpop.f32.mrf.mxu1 }
  0x87   :  { %v116_v36 = vadd.f32 %v115_v32, %v904_v31 }
  0x88   :  { %v110_v28 = vpop.f32.mrf.mxu0 }
  0x89   :  { %v111_v29 = vadd.f32 %v110_v28, %v912_v40 }
  0x8c   :  { %v1029_v8 = vpop.permute.xlu1 %290 }
  0x8e   :  { %v117_v35 = vpop.f32.mrf.mxu1 }
  0x8f   :  { %v118_v37 = vadd.f32 %v117_v35, %v906_v33 }
  0x90   :  { %v187_v39 = vpop.f32.mrf.mxu2  ;;  %v112_v30 = vpop.f32.mrf.mxu0 }
  0x91   :  { %v208_v38 = vpack.c.bf16 %v118_v37, %v116_v36  ;;  %v188_v43 = vadd.f32 %v187_v39, %v908_v34  ;;  %v113_v32 = vadd.f32 %v112_v30, %v918_v46  ;;  %v705_v36 = vld [vmem:[%s1086_s0 + $0x30] sm:$0xf]  ;;  %v733_v37 = vld [vmem:[%s1086_s0 + $0x34] sm:$0xf0]  ;;  %v707_v39 = vld [vmem:[%s1086_s0 + $0x38] sm:$0xf0] }
  0x93   :  { %217 = vmatpush.bf16.xpose.msrb.mxu2 %v208_v38  ;;  %v281_v35 = vpack.c.bf16 %v113_v32, %v111_v29  ;;  %v706_v38 = vor.u32 %v733_v37, %v705_v36  ;;  %v51_v29 = vld [vmem:[%s1086_s0 + $0x18] sm:$0xff]  ;;  %v1043_v37 = vpop.permute.xlu0 %300 }
  0x94   :  { %v201_v53 = vpop.f32.mrf.mxu3  ;;  %v353_v36 = vunpack.c.l.bf16 %v51_v29 }
  0x95   :  { %v202_v62 = vadd.f32 %v201_v53, %v908_v34  ;;  %316 = vmatpush.bf16.msra.mxu1 %v281_v35 }
  0x96   :  { %v129_v41 = vpop.f32.mrf.mxu1 }
  0x97   :  { %v130_v49 = vadd.f32 %v129_v41, %v912_v40 }
  0x98   :  { %v189_v44 = vpop.f32.mrf.mxu2 }
  0x99   :  { %v190_v45 = vadd.f32 %v189_v44, %v914_v42  ;;  %453 = vmatpush.bf16.msrb.mxu1 %v706_v38  ;;  %v731_v44 = vld [vmem:[%s1086_s0 + $0x24] sm:$0xf0] }
  0x9b   :  { %v206_v47 = vpack.c.bf16 %v190_v45, %v188_v43  ;;  %v697_v43 = vld [vmem:[%s1086_s0 + $0x20] sm:$0xf]  ;;  %v730_v45 = vld [vmem:[%s1086_s0 + $0x24] sm:$0xf] }
  0x9c   :  { %v203_v60 = vpop.f32.mrf.mxu3 }
  0x9d   :  { %218 = vmatmul.bf16.vlgmr.msrb.gmra.mxu2 %v206_v47  ;;  %v204_v63 = vadd.f32 %v203_v60, %v914_v42  ;;  %v698_v47 = vor.u32 %v731_v44, %v697_v43 }
  0x9e   :  { %v131_v48 = vpop.f32.mrf.mxu1 }
  0x9f   :  { %v132_v50 = vadd.f32 %v131_v48, %v918_v46  ;;  %v207_v0 = vpack.c.bf16 %v204_v63, %v202_v62  ;;  %v699_v48 = vld [vmem:[%s1086_s0 + $0x28] sm:$0xf0]  ;;  %454 = vmatpush.bf16.msrb.mxu1 %v698_v47 }
  0xa1   :  { %v282_v51 = vpack.c.bf16 %v132_v50, %v130_v49  ;;  %v702_v49 = vor.u32 %v730_v45, %v699_v48 }
  0xa3   :  { %335 = vmatpush.bf16.msra.mxu2 %v282_v51 }
  0xa6   :  { %v134_v52 = vpop.f32.mrf.mxu1 }
  0xa7   :  { %v135_v57 = vadd.f32 %v134_v52, %v904_v31 }
  0xae   :  { %v136_v56 = vpop.f32.mrf.mxu1 }
  0xaf   :  { %v137_v58 = vadd.f32 %v136_v56, %v906_v33 }
  0xb1   :  { %v209_v61 = vpack.c.bf16 %v137_v58, %v135_v57 }
  0xb3   :  { %231 = vmatpush.bf16.xpose.msrb.mxu3 %v209_v61 }
  0xba   :  { %232 = vmatmul.bf16.vlgmr.msrb.gmra.mxu3 %v207_v0 }
  0xbb   :  { %396 = vmatpush.bf16.msra.mxu3 %v686_v59 }
  0xca   :  { %691 = vmatmul.msk.bf16.vlgmr.msra.gmra.mxu3 %vm94_vm0, %v866_v21 }
  0xda   :  { %692 = vmatmul.msk.bf16.gmra.mxu3 %vm94_vm0, %v823_v2 }
 0x120   :  { %v219_v3 = vpop.f32.mrf.mxu2 }
 0x128   :  { %v221_v5 = vpop.f32.mrf.mxu2 }
 0x13d   :  { %v233_v4 = vpop.f32.mrf.mxu3 }
 0x13e   :  { %v234_v10 = vadd.f32 %v233_v4, %v219_v3 }
 0x145   :  { %v235_v6 = vpop.f32.mrf.mxu3 }
 0x146   :  { %v236_v9 = vadd.f32 %v235_v6, %v221_v5  ;;  %v49_v5 = vld [vmem:[%s1086_s0 + $0x8] sm:$0xff] }
 0x147   :  { %v349_v7 = vunpack.c.l.bf16 %v49_v5 }
 0x148   :  { %264 = vmatpush.msrb.mxu0 %v236_v9 }
 0x14a   :  { %265 = vmatpush.msrb.mxu0 %v234_v10 }
 0x14b   :  { %669 = vmatmul.msk.f32.vlgmr.msrb.gmra.mxu0 %vm94_vm0, %v948_v11 }
 0x14c   :  { %415 = vmatpush.bf16.msra.mxu0 %v690_v12 }
 0x14d   :  { %v398_v13 = vpop.f32.mrf.mxu3 }
 0x14e   :  { %v399_v19 = vadd.f32 %v398_v13, %v912_v40 }
 0x153   :  { %670 = vmatmul.msk.f32.gmra.mxu0 %vm94_vm0, %v955_v14 }
 0x155   :  { %v400_v15 = vpop.f32.mrf.mxu3 }
 0x156   :  { %v401_v20 = vadd.f32 %v400_v15, %v918_v46  ;;  %v50_v15 = vld [vmem:[%s1086_s0 + $0x10] sm:$0xff] }
 0x157   :  { %v352_v30 = vunpack.c.h.bf16 %v50_v15 }
 0x158   :  { %v538_v26 = vpack.c.bf16 %v401_v20, %v399_v19 }
 0x15b   :  { %671 = vmatmul.msk.f32.gmra.mxu0 %vm94_vm0, %v962_v16 }
 0x15d   :  { %v403_v17 = vpop.f32.mrf.mxu3 }
 0x15e   :  { %v404_v24 = vadd.f32 %v403_v17, %v904_v31  ;;  %v350_v17 = vunpack.c.h.bf16 %v49_v5 }
 0x163   :  { %672 = vmatmul.msk.f32.gmra.mxu0 %vm94_vm0, %v969_v18 }
 0x165   :  { %v405_v23 = vpop.f32.mrf.mxu3 }
 0x166   :  { %v406_v25 = vadd.f32 %v405_v23, %v906_v33  ;;  %v351_v23 = vunpack.c.l.bf16 %v50_v15 }
 0x168   :  { %v477_v27 = vpack.c.bf16 %v406_v25, %v404_v24  ;;  %v1036_v24 = vpop.permute.xlu2 %295 }
 0x16a   :  { %486 = vmatpush.bf16.xpose.msrb.mxu3 %v477_v27 }
 0x16b   :  { %693 = vmatmul.msk.bf16.vlgmr.msra.gmra.mxu0 %vm94_vm0, %v866_v21  ;;  %v732_v21 = vld [vmem:[%s1086_s0 + $0x34] sm:$0xf] }
 0x16c   :  { %v710_v41 = vor.u32 %v732_v21, %v707_v39 }
 0x16e   :  { %467 = vmatpush.bf16.msrb.mxu2 %v710_v41 }
 0x172   :  { %553 = vmatpush.bf16.msra.mxu3 %v538_v26  ;;  %468 = vmatpush.bf16.msrb.mxu2 %v702_v49 }
 0x17b   :  { %694 = vmatmul.msk.bf16.gmra.mxu0 %vm94_vm0, %v823_v2 }
 0x1c8   :  { %v267_v2 = vpop.f32.mrf.mxu0 }
 0x1d0   :  { %v270_v50 = vpop.f32.mrf.mxu0 }
 0x1d1   :  { %v279_v51 = vpack.c.bf16 %v270_v50, %v267_v2  ;;  %v354_v2 = vunpack.c.h.bf16 %v51_v29 }
 0x1d3   :  { %673 = vmatmul.msk.bf16.vlgmr.msra.gmra.mxu1 %vm94_vm0, %v279_v51  ;;  %675 = vmatmul.msk.bf16.vlgmr.msra.gmra.mxu2 %vm94_vm0, %v279_v51 }
 0x1d8   :  { %v273_v52 = vpop.f32.mrf.mxu0 }
 0x1e0   :  { %v276_v53 = vpop.f32.mrf.mxu0 }
 0x1e1   :  { %v280_v54 = vpack.c.bf16 %v276_v53, %v273_v52 }
 0x1e3   :  { %674 = vmatmul.msk.bf16.gmra.mxu1 %vm94_vm0, %v280_v54  ;;  %676 = vmatmul.msk.bf16.gmra.mxu2 %vm94_vm0, %v280_v54 }
 0x1e8   :  { %v417_v55 = vpop.f32.mrf.mxu0 }
 0x1e9   :  { %v418_v57 = vadd.f32 %v417_v55, %v912_v40  ;;  %v48_v40 = vld [vmem:[%s1086_s0] sm:$0xff] }
 0x1f0   :  { %v419_v56 = vpop.f32.mrf.mxu0 }
 0x1f1   :  { %v420_v58 = vadd.f32 %v419_v56, %v918_v46  ;;  %v347_v46 = vunpack.c.l.bf16 %v48_v40 }
 0x1f3   :  { %v539_v59 = vpack.c.bf16 %v420_v58, %v418_v57  ;;  %711 = vmatmul.msk.bf16.vlgmr.msrb.gmra.mxu1 %vm174_vm1, %v871_v22  ;;  %712 = vmatmul.msk.bf16.vlgmr.msrb.gmra.mxu2 %vm174_vm1, %v871_v22 }
 0x1f5   :  { %572 = vmatpush.bf16.msrb.mxu0 %v539_v59 }
 0x1f8   :  { %v422_v60 = vpop.f32.mrf.mxu0 }
 0x1f9   :  { %v423_v62 = vadd.f32 %v422_v60, %v904_v31  ;;  %v348_v31 = vunpack.c.h.bf16 %v48_v40 }
 0x200   :  { %v424_v61 = vpop.f32.mrf.mxu0 }
 0x201   :  { %v425_v63 = vadd.f32 %v424_v61, %v906_v33 }
 0x203   :  { %v478_v0 = vpack.c.bf16 %v425_v63, %v423_v62 }
 0x205   :  { %500 = vmatpush.bf16.xpose.msra.mxu1 %v478_v0 }
 0x250   :  { %v318_v3 = vpop.f32.mrf.mxu1 }
 0x251   :  { %v319_v4 = vadd.f32 %v318_v3, %v1022_v1 }
 0x253   :  { %v355_v22 = vadd.f32 %v347_v46, %v319_v4  ;;  %v678_v4 = vld [vmem:[%s1086_s0 + $0x28] sm:$0xff] }
 0x255   :  { %363 = vst [vmem:[#allocation2] sm:$0xff] %v355_v22 }
 0x256   :  { %v337_v33 = vpop.f32.mrf.mxu2 }
 0x257   :  { %v338_v6 = vadd.f32 %v337_v33, %v1022_v1  ;;  %v587_v33 = vunpack.c.h.bf16 %v678_v4 }
 0x258   :  { %v320_v9 = vpop.f32.mrf.mxu1 }
 0x259   :  { %v356_v10 = vadd.f32 %v348_v31, %v338_v6  ;;  %v321_v12 = vadd.f32 %v320_v9, %v1029_v8 }
 0x25b   :  { %364 = vst [vmem:[#allocation2 + $0x8] sm:$0xff] %v356_v10  ;;  %v357_v13 = vadd.f32 %v349_v7, %v321_v12  ;;  %v679_v12 = vld [vmem:[%s1086_s0 + $0x30] sm:$0xff] }
 0x25d   :  { %365 = vst [vmem:[#allocation2 + $0x10] sm:$0xff] %v357_v13  ;;  %v586_v13 = vunpack.c.l.bf16 %v678_v4 }
 0x25e   :  { %v339_v19 = vpop.f32.mrf.mxu2 }
 0x25f   :  { %v340_v20 = vadd.f32 %v339_v19, %v1029_v8  ;;  %v589_v19 = vunpack.c.h.bf16 %v679_v12 }
 0x260   :  { %v323_v25 = vpop.f32.mrf.mxu1 }
 0x261   :  { %v358_v26 = vadd.f32 %v350_v17, %v340_v20  ;;  %v324_v27 = vadd.f32 %v323_v25, %v1036_v24 }
 0x263   :  { %366 = vst [vmem:[#allocation2 + $0x18] sm:$0xff] %v358_v26  ;;  %v359_v28 = vadd.f32 %v351_v23, %v324_v27  ;;  %v680_v26 = vld [vmem:[%s1086_s0 + $0x38] sm:$0xff]  ;;  %v588_v27 = vunpack.c.l.bf16 %v679_v12 }
 0x265   :  { %367 = vst [vmem:[#allocation2 + $0x20] sm:$0xff] %v359_v28 }
 0x266   :  { %v342_v32 = vpop.f32.mrf.mxu2 }
 0x267   :  { %v343_v35 = vadd.f32 %v342_v32, %v1036_v24 }
 0x268   :  { %v325_v21 = vpop.f32.mrf.mxu1 }
 0x269   :  { %v360_v38 = vadd.f32 %v352_v30, %v343_v35  ;;  %v326_v39 = vadd.f32 %v325_v21, %v1043_v37  ;;  %v591_v30 = vunpack.c.h.bf16 %v680_v26  ;;  %v590_v21 = vunpack.c.l.bf16 %v680_v26 }
 0x26b   :  { %368 = vst [vmem:[#allocation2 + $0x28] sm:$0xff] %v360_v38  ;;  %v361_v41 = vadd.f32 %v353_v36, %v326_v39 }
 0x26d   :  { %369 = vst [vmem:[#allocation2 + $0x30] sm:$0xff] %v361_v41 }
 0x26e   :  { %v344_v43 = vpop.f32.mrf.mxu2 }
 0x26f   :  { %v345_v44 = vadd.f32 %v344_v43, %v1043_v37 }
 0x270   :  { %v456_v45 = vpop.f32.mrf.mxu1 }
 0x271   :  { %v362_v47 = vadd.f32 %v354_v2, %v345_v44  ;;  %v457_v50 = vadd.f32 %v456_v45, %v908_v34 }
 0x273   :  { %370 = vst [vmem:[#allocation2 + $0x38] sm:$0xff] %v362_v47 }
 0x276   :  { %v470_v48 = vpop.f32.mrf.mxu2 }
 0x277   :  { %v471_v54 = vadd.f32 %v470_v48, %v908_v34 }
 0x278   :  { %v458_v49 = vpop.f32.mrf.mxu1 }
 0x279   :  { %v459_v51 = vadd.f32 %v458_v49, %v914_v42 }
 0x27b   :  { %v475_v52 = vpack.c.bf16 %v459_v51, %v457_v50 }
 0x27d   :  { %487 = vmatmul.bf16.vlgmr.msrb.gmra.mxu3 %v475_v52 }
 0x27e   :  { %v472_v53 = vpop.f32.mrf.mxu2 }
 0x27f   :  { %v473_v55 = vadd.f32 %v472_v53, %v914_v42 }
 0x281   :  { %v476_v56 = vpack.c.bf16 %v473_v55, %v471_v54 }
 0x283   :  { %501 = vmatmul.bf16.vlgmr.msra.gmra.mxu1 %v476_v56 }
 0x300   :  { %v488_v57 = vpop.f32.mrf.mxu3  ;;  %v502_v58 = vpop.f32.mrf.mxu1 }
 0x301   :  { %v503_v62 = vadd.f32 %v502_v58, %v488_v57 }
 0x308   :  { %v490_v59 = vpop.f32.mrf.mxu3  ;;  %v504_v60 = vpop.f32.mrf.mxu1 }
 0x309   :  { %v505_v61 = vadd.f32 %v504_v60, %v490_v59 }
 0x30b   :  { %521 = vmatpush.msra.mxu2 %v505_v61 }
 0x30d   :  { %522 = vmatpush.msra.mxu2 %v503_v62 }
 0x30e   :  { %713 = vmatmul.msk.f32.vlgmr.msra.gmra.mxu2 %vm94_vm0, %v948_v11  ;;  %v677_v11 = vld [vmem:[%s1086_s0 + $0x20] sm:$0xff]  ;;  %s615_s0 = sshll.u32 %s1093_s7, 4  ;;  %s616_s0 = int_to_ptr.hbm [resolvable:$true] %s615_s0 }
 0x30f   :  { %v584_v22 = vunpack.c.l.bf16 %v677_v11 }
 0x316   :  { %714 = vmatmul.msk.f32.gmra.mxu2 %vm94_vm0, %v955_v14  ;;  %v585_v14 = vunpack.c.h.bf16 %v677_v11 }
 0x31e   :  { %715 = vmatmul.msk.f32.gmra.mxu2 %vm94_vm0, %v962_v16 }
 0x326   :  { %716 = vmatmul.msk.f32.gmra.mxu2 %vm94_vm0, %v969_v18 }
 0x391   :  { %v524_v34 = vpop.f32.mrf.mxu2 }
 0x399   :  { %v527_v42 = vpop.f32.mrf.mxu2 }
 0x39a   :  { %v536_v63 = vpack.c.bf16 %v527_v42, %v524_v34 }
 0x39c   :  { %717 = vmatmul.msk.bf16.vlgmr.msra.gmra.mxu3 %vm94_vm0, %v536_v63  ;;  %719 = vmatmul.msk.bf16.vlgmr.msrb.gmra.mxu0 %vm94_vm0, %v536_v63 }
 0x3a1   :  { %v530_v0 = vpop.f32.mrf.mxu2 }
 0x3a9   :  { %v533_v40 = vpop.f32.mrf.mxu2 }
 0x3aa   :  { %v537_v46 = vpack.c.bf16 %v533_v40, %v530_v0 }
 0x3ac   :  { %718 = vmatmul.msk.bf16.gmra.mxu3 %vm94_vm0, %v537_v46  ;;  %720 = vmatmul.msk.bf16.gmra.mxu0 %vm94_vm0, %v537_v46 }
 0x419   :  { %v574_v16 = vpop.f32.mrf.mxu0 }
 0x41a   :  { %v575_v18 = vadd.f32 %v574_v16, %v1022_v1 }
 0x41c   :  { %v593_v3 = vadd.f32 %v585_v14, %v575_v18 }
 0x41e   :  { %602 = vst [vmem:[#allocation2 + $0x48] sm:$0xff] %v593_v3 }
 0x41f   :  { %v555_v5 = vpop.f32.mrf.mxu3 }
 0x420   :  { %v556_v31 = vadd.f32 %v555_v5, %v1022_v1 }
 0x421   :  { %v576_v6 = vpop.f32.mrf.mxu0 }
 0x422   :  { %v592_v7 = vadd.f32 %v584_v22, %v556_v31  ;;  %v577_v9 = vadd.f32 %v576_v6, %v1029_v8 }
 0x424   :  { %601 = vst [vmem:[#allocation2 + $0x40] sm:$0xff] %v592_v7  ;;  %v595_v10 = vadd.f32 %v587_v33, %v577_v9 }
 0x426   :  { %604 = vst [vmem:[#allocation2 + $0x58] sm:$0xff] %v595_v10 }
 0x427   :  { %v557_v15 = vpop.f32.mrf.mxu3 }
 0x428   :  { %v558_v17 = vadd.f32 %v557_v15, %v1029_v8 }
 0x429   :  { %v579_v20 = vpop.f32.mrf.mxu0 }
 0x42a   :  { %v594_v23 = vadd.f32 %v586_v13, %v558_v17  ;;  %v580_v1 = vadd.f32 %v579_v20, %v1036_v24 }
 0x42c   :  { %603 = vst [vmem:[#allocation2 + $0x50] sm:$0xff] %v594_v23  ;;  %v597_v25 = vadd.f32 %v589_v19, %v580_v1 }
 0x42e   :  { %606 = vst [vmem:[#allocation2 + $0x68] sm:$0xff] %v597_v25 }
 0x42f   :  { %v560_v28 = vpop.f32.mrf.mxu3 }
 0x430   :  { %v561_v29 = vadd.f32 %v560_v28, %v1036_v24 }
 0x431   :  { %v581_v32 = vpop.f32.mrf.mxu0 }
 0x432   :  { %v596_v35 = vadd.f32 %v588_v27, %v561_v29  ;;  %v582_v8 = vadd.f32 %v581_v32, %v1043_v37 }
 0x434   :  { %605 = vst [vmem:[#allocation2 + $0x60] sm:$0xff] %v596_v35  ;;  %v599_v36 = vadd.f32 %v591_v30, %v582_v8 }
 0x436   :  { %608 = vst [vmem:[#allocation2 + $0x78] sm:$0xff] %v599_v36 }
 0x437   :  { %v562_v38 = vpop.f32.mrf.mxu3 }
 0x438   :  { %v563_v39 = vadd.f32 %v562_v38, %v1043_v37 }
 0x43a   :  { %v598_v24 = vadd.f32 %v590_v21, %v563_v39 }
 0x43c   :  { %607 = vst [vmem:[#allocation2 + $0x70] sm:$0xff] %v598_v24 }
 0x43d   :  { %621 = dma.vmem_to_hbm [thread:$0]  %s614_s17, 2048, %s616_s0, [#allocation3], %s772_s20, %s772_s20, %s773_s21  }
 0x43e   :  { %768 = dma.done.wait [#allocation3], 2048  }
 0x43f   :  { %769 = vsyncadd [#allocation3], 4294965248 }
 0x440   :  { %626 = vsyncpa [#allocation3], 1 }

</bundles_post_ra>
